<compile_context>
chip_gen: v5e
topology: v5e:2x2
jax: 0.10.0
libtpu: 0.0.40
codegen_flags: <defaults>
</compile_context>

<pallas_src>
import functools

import jax
import jax.numpy as jnp
from jax import lax
from jax.experimental import pallas as pl
from jax.experimental.pallas import tpu as pltpu

_LANES = 128


def _round_up(n, m):
    return (n + m - 1) // m * m


# ----------------------------------------------------------------------------
# Pallas kernel: single-shot fused Linear (MXU) + BatchNorm1d (batch stats) + ReLU
# ----------------------------------------------------------------------------
def _projection_head_kernel(x_ref, w_ref, gb_ref, o_ref, *, eps):
    # Whole problem resident in VMEM; one MXU matmul, f32 accumulate.
    y = jnp.dot(x_ref[...], w_ref[...], preferred_element_type=jnp.float32)

    # BatchNorm1d training-mode statistics over the full batch (axis 0, biased variance).
    # Numerically-stable two-pass form (E[(y-mean)^2]) to stay within 1e-4 of the reference.
    mean = jnp.mean(y, axis=0, keepdims=True)
    var = jnp.mean(jnp.square(y - mean), axis=0, keepdims=True)

    gamma = gb_ref[0:1, :]
    beta = gb_ref[1:2, :]

    # Fold BN into one scale/shift FMA per element; rsqrt goes to the EUP slot.
    s = gamma * lax.rsqrt(var + eps)          # (1, Np)
    t = beta - mean * s                       # (1, Np)
    o_ref[...] = jnp.maximum(y * s + t, 0.0)  # ReLU


def projection_head(x, w_padded, gb_padded, n_out, *, eps=1e-5):
    """Fused Linear (bias-free) -> BatchNorm1d(batch stats) -> ReLU.

    x:         (B, K)  float32
    w_padded:  (K, Np) float32, Np = round_up(n_out, 128), extra columns zero
    gb_padded: (2, Np) float32, row 0 = BN gamma, row 1 = BN beta, extra columns zero
    returns:   (B, n_out) float32
    """
    B, K = x.shape
    Kw, Np = w_padded.shape
    assert Kw == K, "weight in_features mismatch"
    assert gb_padded.shape == (2, Np)
    assert Np % _LANES == 0, "padded out_features must be lane-dense (multiple of 128)"

    # Sanity: whole problem (double-buffered inputs + output) must fit comfortably in VMEM.
    approx_bytes = 4 * (B * K + K * Np + 2 * Np + B * Np)
    assert approx_bytes < 32 * 1024 * 1024, "problem too large for single-shot kernel"

    kernel = functools.partial(_projection_head_kernel, eps=eps)
    out = pl.pallas_call(
        kernel,
        out_shape=jax.ShapeDtypeStruct((B, Np), jnp.float32),
        # No grid: single invocation, whole arrays placed in VMEM.
        in_specs=[
            pl.BlockSpec(memory_space=pltpu.MemorySpace.VMEM),  # x
            pl.BlockSpec(memory_space=pltpu.MemorySpace.VMEM),  # W (padded)
            pl.BlockSpec(memory_space=pltpu.MemorySpace.VMEM),  # [gamma; beta] (padded)
        ],
        out_specs=pl.BlockSpec(memory_space=pltpu.MemorySpace.VMEM),
    )(x, w_padded, gb_padded)

    return out[:, :n_out] if n_out != Np else out


# ----------------------------------------------------------------------------
# ProjectionHead wrapper (PyTorch-equivalent parameter init, padded once at build time)
# ----------------------------------------------------------------------------
class ProjectionHeadPallas:
    def __init__(self, in_features, out_features, key):
        kw, kb = jax.random.split(key)
        bound = 1.0 / jnp.sqrt(in_features)
        # nn.Linear default init (uniform(-1/sqrt(fan_in), 1/sqrt(fan_in)))
        w = jax.random.uniform(kw, (in_features, out_features), jnp.float32, -bound, bound)
        b = jax.random.uniform(kb, (1, out_features), jnp.float32, -bound, bound)
        gamma = jnp.ones((1, out_features), jnp.float32)   # BatchNorm1d weight init
        beta = jnp.zeros((1, out_features), jnp.float32)   # BatchNorm1d bias init

        # Pad the output-feature axis to a lane-dense width once, at init time.
        n_pad = _round_up(out_features, _LANES)
        w_pad = jnp.zeros((in_features, n_pad), jnp.float32).at[:, :out_features].set(w)
        gb_pad = jnp.zeros((2, n_pad), jnp.float32)
        gb_pad = gb_pad.at[0, :out_features].set(gamma[0]).at[1, :out_features].set(beta[0])

        self.out_features = out_features
        self.w_pad = w_pad
        self.gb_pad = gb_pad
        self.ref_params = (w, b, gamma, beta)  # unpadded PyTorch-layout params for checking

    def __call__(self, x):
        return projection_head(x, self.w_pad, self.gb_pad, self.out_features)


# Pure-JAX reference of ProjectionHead forward (train-mode BN, with the Linear bias —
# the bias cancels exactly under batch-mean subtraction, so it matches the bias-free kernel).
def _projection_head_ref(x, w, b, gamma, beta, eps=1e-5):
    y = x @ w + b
    mean = jnp.mean(y, axis=0, keepdims=True)
    var = jnp.mean(jnp.square(y - mean), axis=0, keepdims=True)
    y_hat = (y - mean) / jnp.sqrt(var + eps)
    return jnp.maximum(y_hat * gamma + beta, 0.0)


if __name__ == "__main__":
    key = jax.random.PRNGKey(0)
    key, kx, kp = jax.random.split(key, 3)

    # Small shapes consistent with the module's usage (identity VIDEO encoder -> projection):
    # batch=8, in_features=768, out_features=32.
    B, F, D = 8, 768, 32
    x = jax.random.normal(kx, (B, F), jnp.float32)

    model = ProjectionHeadPallas(in_features=F, out_features=D, key=kp)
    out = model(x)
    out = jax.block_until_ready(out)

    # Correctness check against the pure-JAX reference (PyTorch semantics incl. bias).
    w, b, gamma, beta = model.ref_params
    ref = _projection_head_ref(x, w, b, gamma, beta)
    assert out.shape == (B, D)
    assert jnp.allclose(out, ref, atol=1e-4, rtol=1e-4)

    print("KERNEL_OK")
</pallas_src>

<mosaic_0001>
module attributes {stable_mosaic.version = 11 : i64} {
  func.func @_projection_head_kernel(%arg0: memref<8x768xf32, #tpu.memory_space<vmem>>, %arg1: memref<768x128xf32, #tpu.memory_space<vmem>>, %arg2: memref<2x128xf32, #tpu.memory_space<vmem>>, %arg3: memref<8x128xf32, #tpu.memory_space<vmem>>) attributes {dimension_semantics = [], scalar_prefetch = 0 : i64, scratch_operands = 0 : i64, tpu.core_type = #tpu.core_type<tc>} {
    %c0 = arith.constant 0 : index
    %c0_0 = arith.constant 0 : index
    %0 = vector.load %arg0[%c0, %c0_0] : memref<8x768xf32, #tpu.memory_space<vmem>>, vector<8x768xf32>
    %c0_1 = arith.constant 0 : index
    %c0_2 = arith.constant 0 : index
    %1 = vector.load %arg1[%c0_1, %c0_2] : memref<768x128xf32, #tpu.memory_space<vmem>>, vector<768x128xf32>
    %cst = arith.constant dense<0.000000e+00> : vector<8x128xf32>
    %2 = tpu.matmul %0, %1, %cst {dimension_numbers = #tpu.dot_dimension_numbers<[1], [0], [0], [1], [0, 0, 1, 1], [], []>} : vector<8x768xf32>, vector<768x128xf32>, vector<8x128xf32> -> vector<8x128xf32>
    %cst_3 = arith.constant dense<0.000000e+00> : vector<128xf32>
    %3 = vector.multi_reduction <add>, %2, %cst_3 [0] : vector<8x128xf32> to vector<128xf32>
    %4 = vector.shape_cast %3 : vector<128xf32> to vector<1x128xf32>
    %cst_4 = arith.constant 8.000000e+00 : f32
    %5 = vector.broadcast %cst_4 : f32 to vector<1x128xf32>
    %6 = arith.divf %4, %5 : vector<1x128xf32>
    %7 = vector.broadcast %6 : vector<1x128xf32> to vector<8x128xf32>
    %8 = arith.subf %2, %7 : vector<8x128xf32>
    %9 = arith.mulf %8, %8 : vector<8x128xf32>
    %cst_5 = arith.constant dense<0.000000e+00> : vector<128xf32>
    %10 = vector.multi_reduction <add>, %9, %cst_5 [0] : vector<8x128xf32> to vector<128xf32>
    %11 = vector.shape_cast %10 : vector<128xf32> to vector<1x128xf32>
    %cst_6 = arith.constant 8.000000e+00 : f32
    %12 = vector.broadcast %cst_6 : f32 to vector<1x128xf32>
    %13 = arith.divf %11, %12 : vector<1x128xf32>
    %c0_7 = arith.constant 0 : index
    %c0_8 = arith.constant 0 : index
    %14 = vector.load %arg2[%c0_7, %c0_8] : memref<2x128xf32, #tpu.memory_space<vmem>>, vector<1x128xf32>
    %c1 = arith.constant 1 : index
    %c0_9 = arith.constant 0 : index
    %15 = vector.load %arg2[%c1, %c0_9] : memref<2x128xf32, #tpu.memory_space<vmem>>, vector<1x128xf32>
    %cst_10 = arith.constant 9.99999974E-6 : f32
    %16 = vector.broadcast %cst_10 : f32 to vector<1x128xf32>
    %17 = arith.addf %13, %16 : vector<1x128xf32>
    %18 = math.rsqrt %17 : vector<1x128xf32>
    %19 = arith.mulf %14, %18 : vector<1x128xf32>
    %20 = arith.mulf %6, %19 : vector<1x128xf32>
    %21 = arith.subf %15, %20 : vector<1x128xf32>
    %22 = vector.broadcast %19 : vector<1x128xf32> to vector<8x128xf32>
    %23 = arith.mulf %2, %22 : vector<8x128xf32>
    %24 = vector.broadcast %21 : vector<1x128xf32> to vector<8x128xf32>
    %25 = arith.addf %23, %24 : vector<8x128xf32>
    %cst_11 = arith.constant 0.000000e+00 : f32
    %26 = vector.broadcast %cst_11 : f32 to vector<8x128xf32>
    %27 = arith.maximumf %25, %26 : vector<8x128xf32>
    %c0_12 = arith.constant 0 : index
    %c0_13 = arith.constant 0 : index
    %28 = vector.load %arg3[%c0_12, %c0_13] : memref<8x128xf32, #tpu.memory_space<vmem>>, vector<8x128xf32>
    tpu.vector_store %arg3[%c0_12, %c0_13], %27 {strides = array<i32>} : memref<8x128xf32, #tpu.memory_space<vmem>>, vector<8x128xf32>,
    return
  }
}

</mosaic_0001>

<bundles_post_ra>
// kernel: tpu_custom_call.1
= control target key start
LH: loop header
LB: loop body
LE: loop exit
PB: predicated region body
PF: predicated region fallthrough
CT: control target
= control target key end

     0   :  { %8 = vsyncpa [#allocation3], 0  ;;  %s495_s0 = inlined_call_operand.hbm [shape: f32[8,768], index: 0, kind: input, shape index: {}]   ;;  %s496_s1 = inlined_call_operand.hbm [shape: f32[768,128], index: 1, kind: input, shape index: {}]   ;;  %s497_s2 = inlined_call_operand.hbm [shape: f32[2,128], index: 2, kind: input, shape index: {}]   ;;  %s498_s3 = inlined_call_operand.hbm [shape: f32[8,128], index: 3, kind: output, shape index: {}]  }
   0x1   :  { %9 = vsyncpa [#allocation6], 0  ;;  %s26_s14 = sshll.u32 %s496_s1, 4  ;;  %s27_s14 = int_to_ptr.hbm [resolvable:$true] %s26_s14 }
   0x2   :  { %10 = vsyncpa [#allocation4], 0  ;;  %s456_s15 = smov [#allocation5]   ;;  %s16_s19 = sshll.u32 %s495_s0, 4  ;;  %s17_s19 = int_to_ptr.hbm [resolvable:$true] %s16_s19 }
   0x3   :  { %s28_s16 = sshll.u32 %s456_s15, 4  ;;  %s457_s20 = smov 128   ;;  %s29_s16 = int_to_ptr.vmem [resolvable:$true] %s28_s16 }
   0x4   :  { %s458_s21 = smov 8   ;;  %s459_s22 = smov [#allocation2]  }
   0x5   :  { %34 = dma.hbm_to_vmem [thread:$0]  %s27_s14, 12288, %s29_s16, [#allocation6], %s457_s20, %s457_s20, %s458_s21  }
   0x6   :  { %s18_s23 = sshll.u32 %s459_s22, 4  ;;  %s40_s26 = sshll.u32 %s497_s2, 4  ;;  %s19_s23 = int_to_ptr.vmem [resolvable:$true] %s18_s23  ;;  %s41_s26 = int_to_ptr.hbm [resolvable:$true] %s40_s26 }
   0x7   :  { %21 = dma.hbm_to_vmem [thread:$0]  %s17_s19, 768, %s19_s23, [#allocation3]  }
   0x8   :  { %s460_s1 = smov [#allocation7]  }
   0x9   :  { %s42_s27 = sshll.u32 %s460_s1, 4  ;;  %s43_s27 = int_to_ptr.vmem [resolvable:$true] %s42_s27 }
   0xa   :  { %45 = dma.hbm_to_vmem [thread:$0]  %s41_s26, 32, %s43_s27, [#allocation6]  }
   0xb   :  { %450 = dma.done.wait [#allocation3], 768  }
   0xc   :  { %451 = vsyncadd [#allocation3], 4294966528 }
   0xd   :  { %452 = dma.done.wait [#allocation6], 12320  }
   0xe   :  { %453 = vsyncadd [#allocation6], 4294954976  ;;  %v79_v0 = vld [vmem:[#allocation5 + $0x78] sm:$0xff]  ;;  %v78_v1 = vld [vmem:[#allocation5 + $0x70] sm:$0xff]  ;;  %s462_s0 = smov [#allocation8]   ;;  %s332_s30 = sshll.u32 %s498_s3, 4  ;;  %s333_s30 = int_to_ptr.hbm [resolvable:$true] %s332_s30 }
   0xf   :  { %v95_v2 = vld [vmem:[#allocation5 + $0xf8] sm:$0xff]  ;;  %160 = vmatpush.msra.mxu0 %v79_v0  ;;  %v94_v3 = vld [vmem:[#allocation5 + $0xf0] sm:$0xff]  ;;  %v77_v4 = vld [vmem:[#allocation5 + $0x68] sm:$0xff]  ;;  %s330_s2 = sshll.u32 %s462_s0, 4  ;;  %s331_s2 = int_to_ptr.vmem [resolvable:$true] %s330_s2 }
  0x10   :  { %180 = vmatpush.msra.mxu1 %v95_v2  ;;  %v93_v5 = vld [vmem:[#allocation5 + $0xe8] sm:$0xff]  ;;  %v76_v6 = vld [vmem:[#allocation5 + $0x60] sm:$0xff]  ;;  %v75_v8 = vld [vmem:[#allocation5 + $0x58] sm:$0xff] }
  0x11   :  { %161 = vmatpush.msra.mxu0 %v78_v1  ;;  %v92_v7 = vld [vmem:[#allocation5 + $0xe0] sm:$0xff]  ;;  %v91_v9 = vld [vmem:[#allocation5 + $0xd8] sm:$0xff]  ;;  %v110_v11 = vld [vmem:[#allocation5 + $0x170] sm:$0xff] }
  0x12   :  { %181 = vmatpush.msra.mxu1 %v94_v3  ;;  %v111_v10 = vld [vmem:[#allocation5 + $0x178] sm:$0xff]  ;;  %v74_v13 = vld [vmem:[#allocation5 + $0x50] sm:$0xff]  ;;  %v109_v15 = vld [vmem:[#allocation5 + $0x168] sm:$0xff] }
  0x13   :  { %162 = vmatpush.msra.mxu0 %v77_v4  ;;  %v127_v12 = vld [vmem:[#allocation5 + $0x1f8] sm:$0xff]  ;;  %v90_v14 = vld [vmem:[#allocation5 + $0xd0] sm:$0xff]  ;;  %200 = vmatpush.msra.mxu2 %v111_v10  ;;  %v73_v17 = vld [vmem:[#allocation5 + $0x48] sm:$0xff] }
  0x14   :  { %182 = vmatpush.msra.mxu1 %v93_v5  ;;  %220 = vmatpush.msra.mxu3 %v127_v12  ;;  %v126_v16 = vld [vmem:[#allocation5 + $0x1f0] sm:$0xff]  ;;  %v89_v18 = vld [vmem:[#allocation5 + $0xc8] sm:$0xff]  ;;  %v108_v20 = vld [vmem:[#allocation5 + $0x160] sm:$0xff] }
  0x15   :  { %163 = vmatpush.msra.mxu0 %v76_v6  ;;  %201 = vmatpush.msra.mxu2 %v110_v11  ;;  %v125_v19 = vld [vmem:[#allocation5 + $0x1e8] sm:$0xff]  ;;  %v124_v21 = vld [vmem:[#allocation5 + $0x1e0] sm:$0xff]  ;;  %v107_v24 = vld [vmem:[#allocation5 + $0x158] sm:$0xff] }
  0x16   :  { %183 = vmatpush.msra.mxu1 %v92_v7  ;;  %221 = vmatpush.msra.mxu3 %v126_v16  ;;  %v72_v22 = vld [vmem:[#allocation5 + $0x40] sm:$0xff]  ;;  %v123_v25 = vld [vmem:[#allocation5 + $0x1d8] sm:$0xff]  ;;  %v106_v28 = vld [vmem:[#allocation5 + $0x150] sm:$0xff] }
  0x17   :  { %164 = vmatpush.msra.mxu0 %v75_v8  ;;  %v88_v23 = vld [vmem:[#allocation5 + $0xc0] sm:$0xff]  ;;  %202 = vmatpush.msra.mxu2 %v109_v15  ;;  %v71_v26 = vld [vmem:[#allocation5 + $0x38] sm:$0xff]  ;;  %v122_v29 = vld [vmem:[#allocation5 + $0x1d0] sm:$0xff] }
  0x18   :  { %184 = vmatpush.msra.mxu1 %v91_v9  ;;  %222 = vmatpush.msra.mxu3 %v125_v19  ;;  %v87_v27 = vld [vmem:[#allocation5 + $0xb8] sm:$0xff]  ;;  %v70_v30 = vld [vmem:[#allocation5 + $0x30] sm:$0xff]  ;;  %v105_v32 = vld [vmem:[#allocation5 + $0x148] sm:$0xff] }
  0x19   :  { %165 = vmatpush.msra.mxu0 %v74_v13  ;;  %203 = vmatpush.msra.mxu2 %v108_v20  ;;  %v86_v31 = vld [vmem:[#allocation5 + $0xb0] sm:$0xff]  ;;  %v121_v33 = vld [vmem:[#allocation5 + $0x1c8] sm:$0xff]  ;;  %v104_v36 = vld [vmem:[#allocation5 + $0x140] sm:$0xff] }
  0x1a   :  { %185 = vmatpush.msra.mxu1 %v90_v14  ;;  %223 = vmatpush.msra.mxu3 %v124_v21  ;;  %v69_v34 = vld [vmem:[#allocation5 + $0x28] sm:$0xff]  ;;  %v120_v37 = vld [vmem:[#allocation5 + $0x1c0] sm:$0xff]  ;;  %v103_v40 = vld [vmem:[#allocation5 + $0x138] sm:$0xff] }
  0x1b   :  { %166 = vmatpush.msra.mxu0 %v73_v17  ;;  %204 = vmatpush.msra.mxu2 %v107_v24  ;;  %v85_v35 = vld [vmem:[#allocation5 + $0xa8] sm:$0xff]  ;;  %v68_v38 = vld [vmem:[#allocation5 + $0x20] sm:$0xff]  ;;  %v119_v41 = vld [vmem:[#allocation5 + $0x1b8] sm:$0xff] }
  0x1c   :  { %186 = vmatpush.msra.mxu1 %v89_v18  ;;  %224 = vmatpush.msra.mxu3 %v123_v25  ;;  %v84_v39 = vld [vmem:[#allocation5 + $0xa0] sm:$0xff]  ;;  %v67_v42 = vld [vmem:[#allocation5 + $0x18] sm:$0xff]  ;;  %v102_v44 = vld [vmem:[#allocation5 + $0x130] sm:$0xff] }
  0x1d   :  { %167 = vmatpush.msra.mxu0 %v72_v22  ;;  %205 = vmatpush.msra.mxu2 %v106_v28  ;;  %v83_v43 = vld [vmem:[#allocation5 + $0x98] sm:$0xff]  ;;  %v118_v45 = vld [vmem:[#allocation5 + $0x1b0] sm:$0xff]  ;;  %v101_v48 = vld [vmem:[#allocation5 + $0x128] sm:$0xff] }
  0x1e   :  { %187 = vmatpush.msra.mxu1 %v88_v23  ;;  %225 = vmatpush.msra.mxu3 %v122_v29  ;;  %v66_v46 = vld [vmem:[#allocation5 + $0x10] sm:$0xff]  ;;  %v117_v49 = vld [vmem:[#allocation5 + $0x1a8] sm:$0xff]  ;;  %v100_v52 = vld [vmem:[#allocation5 + $0x120] sm:$0xff] }
  0x1f   :  { %168 = vmatpush.msra.mxu0 %v71_v26  ;;  %206 = vmatpush.msra.mxu2 %v105_v32  ;;  %v82_v47 = vld [vmem:[#allocation5 + $0x90] sm:$0xff]  ;;  %v65_v50 = vld [vmem:[#allocation5 + $0x8] sm:$0xff]  ;;  %v116_v53 = vld [vmem:[#allocation5 + $0x1a0] sm:$0xff] }
  0x20   :  { %188 = vmatpush.msra.mxu1 %v87_v27  ;;  %226 = vmatpush.msra.mxu3 %v121_v33  ;;  %v81_v51 = vld [vmem:[#allocation5 + $0x88] sm:$0xff]  ;;  %v64_v54 = vld [vmem:[#allocation5] sm:$0xff]  ;;  %v143_v56 = vld [vmem:[#allocation5 + $0x278] sm:$0xff] }
  0x21   :  { %169 = vmatpush.msra.mxu0 %v70_v30  ;;  %207 = vmatpush.msra.mxu2 %v104_v36  ;;  %v80_v55 = vld [vmem:[#allocation5 + $0x80] sm:$0xff]  ;;  %v159_v57 = vld [vmem:[#allocation5 + $0x2f8] sm:$0xff]  ;;  %v142_v60 = vld [vmem:[#allocation5 + $0x270] sm:$0xff] }
  0x22   :  { %189 = vmatpush.msra.mxu1 %v86_v31  ;;  %227 = vmatpush.msra.mxu3 %v120_v37  ;;  %v99_v58 = vld [vmem:[#allocation5 + $0x118] sm:$0xff]  ;;  %v158_v61 = vld [vmem:[#allocation5 + $0x2f0] sm:$0xff]  ;;  %v141_v0 = vld [vmem:[#allocation5 + $0x268] sm:$0xff] }
  0x23   :  { %170 = vmatpush.msra.mxu0 %v69_v34  ;;  %208 = vmatpush.msra.mxu2 %v103_v40  ;;  %v115_v59 = vld [vmem:[#allocation5 + $0x198] sm:$0xff]  ;;  %v98_v62 = vld [vmem:[#allocation5 + $0x110] sm:$0xff]  ;;  %v157_v1 = vld [vmem:[#allocation5 + $0x2e8] sm:$0xff]  ;;  %v461_v40 = vmov 8.0  }
  0x24   :  { %190 = vmatpush.msra.mxu1 %v85_v35  ;;  %228 = vmatpush.msra.mxu3 %v119_v41  ;;  %v114_v63 = vld [vmem:[#allocation5 + $0x190] sm:$0xff]  ;;  %v97_v2 = vld [vmem:[#allocation5 + $0x108] sm:$0xff]  ;;  %v140_v4 = vld [vmem:[#allocation5 + $0x260] sm:$0xff]  ;;  %350 = vrcp.f32 %v461_v40 }
  0x25   :  { %171 = vmatpush.msra.mxu0 %v68_v38  ;;  %209 = vmatpush.msra.mxu2 %v102_v44  ;;  %v113_v3 = vld [vmem:[#allocation5 + $0x188] sm:$0xff]  ;;  %v156_v5 = vld [vmem:[#allocation5 + $0x2e0] sm:$0xff]  ;;  %v139_v8 = vld [vmem:[#allocation5 + $0x258] sm:$0xff] }
  0x26   :  { %191 = vmatpush.msra.mxu1 %v84_v39  ;;  %229 = vmatpush.msra.mxu3 %v118_v45  ;;  %v96_v6 = vld [vmem:[#allocation5 + $0x100] sm:$0xff]  ;;  %v155_v9 = vld [vmem:[#allocation5 + $0x2d8] sm:$0xff]  ;;  %v61_v11 = vld [vmem:[#allocation2 + $0x18] sm:$0xff] }
  0x27   :  { %172 = vmatpush.msra.mxu0 %v67_v42  ;;  %210 = vmatpush.msra.mxu2 %v101_v48  ;;  %v112_v7 = vld [vmem:[#allocation5 + $0x180] sm:$0xff]  ;;  %v138_v12 = vld [vmem:[#allocation5 + $0x250] sm:$0xff]  ;;  %v59_v15 = vld [vmem:[#allocation2 + $0x8] sm:$0xff] }
  0x28   :  { %192 = vmatpush.msra.mxu1 %v83_v43  ;;  %230 = vmatpush.msra.mxu3 %v117_v49  ;;  %v60_v10 = vld [vmem:[#allocation2 + $0x10] sm:$0xff]  ;;  %v154_v13 = vld [vmem:[#allocation5 + $0x2d0] sm:$0xff]  ;;  %v137_v16 = vld [vmem:[#allocation5 + $0x248] sm:$0xff] }
  0x29   :  { %173 = vmatpush.msra.mxu0 %v66_v46  ;;  %211 = vmatpush.msra.mxu2 %v100_v52  ;;  %v58_v14 = vld [vmem:[#allocation2] sm:$0xff]  ;;  %v153_v17 = vld [vmem:[#allocation5 + $0x2c8] sm:$0xff]  ;;  %v136_v18 = vld [vmem:[#allocation5 + $0x240] sm:$0xff] }
  0x2a   :  { %193 = vmatpush.msra.mxu1 %v82_v47  ;;  %231 = vmatpush.msra.mxu3 %v116_v53  ;;  %v152_v19 = vld [vmem:[#allocation5 + $0x2c0] sm:$0xff]  ;;  %v135_v20 = vld [vmem:[#allocation5 + $0x238] sm:$0xff]  ;;  %v134_v22 = vld [vmem:[#allocation5 + $0x230] sm:$0xff]  ;;  %v351_v43 = vpop.eup %350 }
  0x2b   :  { %174 = vmatpush.msra.mxu0 %v65_v50  ;;  %212 = vmatpush.msra.mxu2 %v99_v58  ;;  %v151_v21 = vld [vmem:[#allocation5 + $0x2b8] sm:$0xff]  ;;  %v150_v23 = vld [vmem:[#allocation5 + $0x2b0] sm:$0xff]  ;;  %v133_v24 = vld [vmem:[#allocation5 + $0x228] sm:$0xff]  ;;  %v287_v46 = vmul.f32 8.0, %v351_v43  ;;  %vm291_vm0 = vweird.f32 %v351_v43 }
  0x2c   :  { %194 = vmatpush.msra.mxu1 %v81_v51  ;;  %232 = vmatpush.msra.mxu3 %v115_v59  ;;  %v149_v25 = vld [vmem:[#allocation5 + $0x2a8] sm:$0xff]  ;;  %v132_v26 = vld [vmem:[#allocation5 + $0x220] sm:$0xff]  ;;  %v131_v28 = vld [vmem:[#allocation5 + $0x218] sm:$0xff] }
  0x2d   :  { %175 = vmatpush.msra.mxu0 %v64_v54  ;;  %213 = vmatpush.msra.mxu2 %v98_v62  ;;  %v148_v27 = vld [vmem:[#allocation5 + $0x2a0] sm:$0xff]  ;;  %v147_v29 = vld [vmem:[#allocation5 + $0x298] sm:$0xff]  ;;  %v130_v30 = vld [vmem:[#allocation5 + $0x210] sm:$0xff]  ;;  %v288_v51 = vsub.f32 1.0, %v287_v46 }
  0x2e   :  { %195 = vmatpush.msra.mxu1 %v80_v55  ;;  %233 = vmatpush.msra.mxu3 %v114_v63  ;;  %v146_v31 = vld [vmem:[#allocation5 + $0x290] sm:$0xff]  ;;  %v129_v32 = vld [vmem:[#allocation5 + $0x208] sm:$0xff]  ;;  %v128_v34 = vld [vmem:[#allocation5 + $0x200] sm:$0xff] }
  0x2f   :  { %240 = vmatpush.msrb.mxu0 %v143_v56  ;;  %214 = vmatpush.msra.mxu2 %v97_v2  ;;  %v145_v33 = vld [vmem:[#allocation5 + $0x288] sm:$0xff]  ;;  %v144_v35 = vld [vmem:[#allocation5 + $0x280] sm:$0xff]  ;;  %v62_v36 = vld [vmem:[#allocation2 + $0x20] sm:$0xff]  ;;  %v289_v54 = vmul.f32 %v351_v43, %v288_v51 }
  0x30   :  { %260 = vmatpush.msrb.mxu1 %v159_v57  ;;  %234 = vmatpush.msra.mxu3 %v113_v3  ;;  %v63_v37 = vld [vmem:[#allocation2 + $0x28] sm:$0xff] }
  0x31   :  { %241 = vmatpush.msrb.mxu0 %v142_v60  ;;  %215 = vmatpush.msra.mxu2 %v96_v6  ;;  %v290_v57 = vadd.f32 %v351_v43, %v289_v54 }
  0x32   :  { %261 = vmatpush.msrb.mxu1 %v158_v61  ;;  %235 = vmatpush.msra.mxu3 %v112_v7 }
  0x33   :  { %242 = vmatpush.msrb.mxu0 %v141_v0  ;;  %216 = vmatmul.f32.vlgmr.msra.gmra.mxu2 %v60_v10  ;;  %v292_v60 = vsel %vm291_vm0, %v351_v43, %v290_v57 }
  0x34   :  { %262 = vmatpush.msrb.mxu1 %v157_v1  ;;  %236 = vmatmul.f32.vlgmr.msra.gmra.mxu3 %v61_v11 }
  0x35   :  { %243 = vmatpush.msrb.mxu0 %v140_v4  ;;  %196 = vmatmul.f32.vlgmr.msra.gmra.mxu1 %v59_v15 }
  0x36   :  { %263 = vmatpush.msrb.mxu1 %v156_v5  ;;  %176 = vmatmul.f32.vlgmr.msra.gmra.mxu0 %v58_v14  ;;  %v303_v14 = vld [vmem:[#allocation7] sm:$0x1] }
  0x37   :  { %244 = vmatpush.msrb.mxu0 %v139_v8 }
  0x38   :  { %264 = vmatpush.msrb.mxu1 %v155_v9 }
  0x39   :  { %245 = vmatpush.msrb.mxu0 %v138_v12 }
  0x3a   :  { %265 = vmatpush.msrb.mxu1 %v154_v13 }
  0x3b   :  { %246 = vmatpush.msrb.mxu0 %v137_v16 }
  0x3c   :  { %266 = vmatpush.msrb.mxu1 %v153_v17 }
  0x3d   :  { %247 = vmatpush.msrb.mxu0 %v136_v18  ;;  %v304_v18 = vld [vmem:[#allocation7 + $0x1] sm:$0x1] }
  0x3e   :  { %267 = vmatpush.msrb.mxu1 %v152_v19 }
  0x3f   :  { %248 = vmatpush.msrb.mxu0 %v135_v20 }
  0x40   :  { %268 = vmatpush.msrb.mxu1 %v151_v21 }
  0x41   :  { %249 = vmatpush.msrb.mxu0 %v134_v22 }
  0x42   :  { %269 = vmatpush.msrb.mxu1 %v150_v23 }
  0x43   :  { %250 = vmatpush.msrb.mxu0 %v133_v24 }
  0x44   :  { %270 = vmatpush.msrb.mxu1 %v149_v25 }
  0x45   :  { %251 = vmatpush.msrb.mxu0 %v132_v26 }
  0x46   :  { %271 = vmatpush.msrb.mxu1 %v148_v27 }
  0x47   :  { %252 = vmatpush.msrb.mxu0 %v131_v28 }
  0x48   :  { %272 = vmatpush.msrb.mxu1 %v147_v29 }
  0x49   :  { %253 = vmatpush.msrb.mxu0 %v130_v30 }
  0x4a   :  { %273 = vmatpush.msrb.mxu1 %v146_v31 }
  0x4b   :  { %254 = vmatpush.msrb.mxu0 %v129_v32 }
  0x4c   :  { %274 = vmatpush.msrb.mxu1 %v145_v33 }
  0x4d   :  { %255 = vmatpush.msrb.mxu0 %v128_v34 }
  0x4e   :  { %275 = vmatpush.msrb.mxu1 %v144_v35  ;;  %256 = vmatmul.f32.vlgmr.msrb.gmra.mxu0 %v62_v36 }
  0x4f   :  { %276 = vmatmul.f32.vlgmr.msrb.gmra.mxu1 %v63_v37 }
  0xb2   :  { %v197_v39 = vpop.f32.mrf.mxu1 }
  0xb3   :  { %v177_v38 = vpop.f32.mrf.mxu0 }
  0xb4   :  { %v198_v41 = vadd.f32 %v197_v39, %v177_v38 }
  0xb6   :  { %v217_v42 = vpop.f32.mrf.mxu2 }
  0xb7   :  { %v218_v44 = vadd.f32 %v217_v42, %v198_v41  ;;  %v237_v45 = vpop.f32.mrf.mxu3 }
  0xb9   :  { %v238_v47 = vadd.f32 %v237_v45, %v218_v44 }
  0xcb   :  { %v257_v48 = vpop.f32.mrf.mxu0 }
  0xcc   :  { %v277_v49 = vpop.f32.mrf.mxu1  ;;  %v258_v50 = vadd.f32 %v257_v48, %v238_v47 }
  0xce   :  { %v278_v52 = vadd.f32 %v277_v49, %v258_v50 }
  0xd0   :  { %v280_v53 = vrot.slane %v278_v52, 4 }
  0xd2   :  { %v281_v55 = vadd.f32 %v280_v53, %v278_v52 }
  0xd4   :  { %v282_v56 = vrot.slane %v281_v55, 2 }
  0xd6   :  { %v283_v58 = vadd.f32 %v282_v56, %v281_v55 }
  0xd8   :  { %v284_v59 = vrot.slane %v283_v58, 1 }
  0xda   :  { %v285_v61 = vadd.f32 %v284_v59, %v283_v58 }
  0xdc   :  { %v293_v62 = vmul.f32 %v292_v60, %v285_v61 }
  0xde   :  { %v294_v63 = vsub.f32 %v278_v52, %v293_v62 }
  0xe0   :  { %v295_v0 = vmul.f32 %v294_v63, %v294_v63 }
  0xe2   :  { %v296_v1 = vrot.slane %v295_v0, 4 }
  0xe4   :  { %v297_v2 = vadd.f32 %v296_v1, %v295_v0 }
  0xe6   :  { %v298_v3 = vrot.slane %v297_v2, 2 }
  0xe8   :  { %v299_v4 = vadd.f32 %v298_v3, %v297_v2 }
  0xea   :  { %v300_v5 = vrot.slane %v299_v4, 1 }
  0xec   :  { %v301_v6 = vadd.f32 %v300_v5, %v299_v4 }
  0xee   :  { %v302_v7 = vmul.f32 %v301_v6, %v292_v60 }
  0xf0   :  { %v305_v8 = vadd.f32 1e-05, %v302_v7 }
  0xf2   :  { %352 = vrsqrt.f32 %v305_v8  ;;  %vm312_vm2 = vweird.f32 %v305_v8 }
  0xf8   :  { %v353_v9 = vpop.eup %352 }
  0xf9   :  { %v307_v10 = vmul.f32 %v353_v9, %v305_v8  ;;  %vm313_vm1 = vweird.f32 %v353_v9 }
  0xfa   :  { %vm314_vm3 = vmor %vm312_vm2, %vm313_vm1 }
  0xfb   :  { %v308_v11 = vmul.f32 %v353_v9, %v307_v10 }
  0xfd   :  { %v309_v12 = vmul.f32 0.5, %v308_v11 }
  0xff   :  { %v310_v13 = vsub.f32 1.5, %v309_v12 }
 0x101   :  { %v311_v15 = vmul.f32 %v353_v9, %v310_v13 }
 0x103   :  { %v315_v16 = vsel %vm314_vm3, %v353_v9, %v311_v15 }
 0x104   :  { %v316_v17 = vmul.f32 %v315_v16, %v303_v14 }
 0x106   :  { %v317_v19 = vmul.f32 %v316_v17, %v293_v62  ;;  %v319_v20 = vperm.slane %v316_v17, 0 }
 0x108   :  { %v318_v21 = vsub.f32 %v304_v18, %v317_v19  ;;  %v320_v22 = vmul.f32 %v319_v20, %v278_v52 }
 0x10a   :  { %v321_v23 = vperm.slane %v318_v21, 0 }
 0x10c   :  { %v322_v24 = vadd.f32 %v321_v23, %v320_v22 }
 0x10e   :  { %v323_v25 = vmax.f32 %v322_v24, 0.0 }
 0x110   :  { %324 = vst [vmem:[#allocation8] sm:$0xff] %v323_v25 }
 0x111   :  { %335 = dma.vmem_to_hbm [thread:$0]  %s331_s2, 128, %s333_s30, [#allocation4]  }
 0x112   :  { %454 = dma.done.wait [#allocation4], 128  }
 0x113   :  { %455 = vsyncadd [#allocation4], 4294967168 }
 0x114   :  { %340 = vsyncpa [#allocation3], 1 }
 0x115   :  { %341 = vsyncpa [#allocation6], 1 }
 0x116   :  { %342 = vsyncpa [#allocation4], 1 }

</bundles_post_ra>
